<compile_context>
chip_gen: v5e
topology: v5e:2x2
jax: 0.10.0
libtpu: 0.0.40
codegen_flags: <defaults>
</compile_context>

<pallas_src>
import functools

import jax
import jax.numpy as jnp
from jax.experimental import pallas as pl
from jax.experimental.pallas import tpu as pltpu

_NEG_BIG = -1e30  # "minus infinity" stand-in that never produces NaNs


def _supcon_kernel(*refs, inv_temp, n_valid, tm, tn, use_labels):
    if use_labels:
        (lab_r_ref, lab_c_ref, fr_ref, fc_ref, out_ref,
         m_sc, l_sc, s_sc, w_sc, c_sc) = refs
    else:
        (mask_ref, fr_ref, fc_ref, out_ref,
         m_sc, l_sc, s_sc, w_sc, c_sc) = refs

    i = pl.program_id(0)
    j = pl.program_id(1)

    @pl.when(j == 0)
    def _():
        m_sc[...] = jnp.full_like(m_sc, _NEG_BIG)
        l_sc[...] = jnp.zeros_like(l_sc)
        s_sc[...] = jnp.zeros_like(s_sc)
        w_sc[...] = jnp.zeros_like(w_sc)
        c_sc[...] = jnp.zeros_like(c_sc)

    # sim tile = (f_rows @ f_cols^T) * (1/T): contract dim 1 of both operands
    # (no materialized transpose), f32 MXU accumulation even for bf16 inputs.
    sim = jax.lax.dot_general(
        fr_ref[...], fc_ref[...],
        dimension_numbers=(((1,), (1,)), ((), ())),
        preferred_element_type=jnp.float32,
    ) * jnp.float32(inv_temp)                                      # [tm, tn]

    r_idx = i * tm + jax.lax.broadcasted_iota(jnp.int32, (tm, tn), 0)
    c_idx = j * tn + jax.lax.broadcasted_iota(jnp.int32, (tm, tn), 1)
    col_valid = c_idx < n_valid            # padded columns never contribute
    not_self = r_idx != c_idx              # logits_mask: drop self-contrast
    lmask = jnp.logical_and(col_valid, not_self)

    # --- online softmax denominator (diagonal kept in the max, like PyTorch) ---
    m_prev = m_sc[...]
    m_new = jnp.maximum(
        m_prev,
        jnp.max(jnp.where(col_valid, sim, _NEG_BIG), axis=1, keepdims=True))
    alpha = jnp.exp(m_prev - m_new)
    p = jnp.exp(jnp.where(lmask, sim, _NEG_BIG) - m_new)           # exp_logits tile
    l_sc[...] = alpha * l_sc[...] + jnp.sum(p, axis=1, keepdims=True)
    m_sc[...] = m_new

    # --- positive-pair accumulators ---
    if use_labels:
        pos = jnp.logical_and(lmask, lab_r_ref[...] == lab_c_ref[...])
        cnt = jnp.sum(pos.astype(jnp.float32), axis=1, keepdims=True)
        s_sc[...] += jnp.sum(jnp.where(pos, sim, 0.0), axis=1, keepdims=True)
        w_sc[...] += cnt
        c_sc[...] += cnt
    else:
        mw = jnp.where(lmask, mask_ref[...].astype(jnp.float32), 0.0)
        s_sc[...] += jnp.sum(mw * sim, axis=1, keepdims=True)
        w_sc[...] += jnp.sum(mw, axis=1, keepdims=True)
        c_sc[...] += jnp.sum(jnp.where(mw > 0, 1.0, mw), axis=1, keepdims=True)

    # --- finalize: per-row mean log-prob over positives ---
    @pl.when(j == pl.num_programs(1) - 1)
    def _():
        log_z = jnp.log(l_sc[...] + 1e-12)
        numer = s_sc[...] - w_sc[...] * (m_sc[...] + log_z)
        mlpp = numer / (c_sc[...] + 1e-12)
        out_ref[...] = jnp.broadcast_to(mlpp, out_ref.shape)


def _round_up(x, m):
    return (x + m - 1) // m * m


def supcon_loss(features, labels=None, mask=None, temperature=0.07,
                block_size=None):
    """Matches SupConLoss.forward semantics (single-view). Returns scalar f32."""
    if features.ndim < 2:
        raise ValueError("`features` needs to be [bsz, ...], at least 2 dims")
    if features.ndim > 2:
        features = features.reshape(features.shape[0], -1)
    B, D = features.shape

    if labels is not None and mask is not None:
        raise ValueError("Cannot define both `labels` and `mask`")

    use_labels = mask is None
    if use_labels:
        if labels is None:
            ids = jnp.arange(B, dtype=jnp.int32)     # eye mask == identity-id equality
        else:
            labels = jnp.asarray(labels).reshape(-1)
            if labels.shape[0] != B:
                raise ValueError("Num of labels does not match num of features")
            ids = labels.astype(jnp.int32)
    else:
        mask = jnp.asarray(mask, dtype=jnp.float32)

    # Tile sizes: 256-aligned keeps a 2x256x256 MXU (v6e/v7x) fully fed; v5e would
    # prefer 128.  Small batches collapse to a single (padded-to-8) tile.
    if block_size is None:
        block_size = 256 if B >= 256 else (128 if B >= 128 else _round_up(B, 8))
    tm = tn = block_size
    B_pad = _round_up(B, tm)
    grid = (B_pad // tm, B_pad // tn)

    feats = features
    if B_pad != B:
        feats = jnp.pad(feats, ((0, B_pad - B), (0, 0)))

    # TODO(synk): add a feature-dim (K) tiling axis so feature tiles stay inside
    # scoped VMEM for very large D; full-D tiles are fine at typical SupCon dims.
    feat_row_spec = pl.BlockSpec((tm, D), lambda i, j: (i, 0))
    feat_col_spec = pl.BlockSpec((tn, D), lambda i, j: (j, 0))
    out_spec = pl.BlockSpec((tm, 128), lambda i, j: (i, 0))
    out_shape = jax.ShapeDtypeStruct((B_pad, 128), jnp.float32)
    scratch = [pltpu.VMEM((tm, 1), jnp.float32)] * 5   # m, l, s, w, c

    kernel = functools.partial(
        _supcon_kernel,
        inv_temp=1.0 / float(temperature),
        n_valid=B, tm=tm, tn=tn, use_labels=use_labels)

    if use_labels:
        ids_pad = jnp.pad(ids, (0, B_pad - B), constant_values=-1)
        args = (ids_pad.reshape(B_pad, 1), ids_pad.reshape(1, B_pad), feats, feats)
        in_specs = [
            pl.BlockSpec((tm, 1), lambda i, j: (i, 0)),
            pl.BlockSpec((1, tn), lambda i, j: (0, j)),
            feat_row_spec,
            feat_col_spec,
        ]
    else:
        mask_pad = mask
        if B_pad != B:
            mask_pad = jnp.pad(mask_pad, ((0, B_pad - B), (0, B_pad - B)))
        args = (mask_pad, feats, feats)
        in_specs = [
            pl.BlockSpec((tm, tn), lambda i, j: (i, j)),
            feat_row_spec,
            feat_col_spec,
        ]

    out = pl.pallas_call(
        kernel,
        out_shape=out_shape,
        grid_spec=pltpu.PrefetchScalarGridSpec(
            num_scalar_prefetch=0,
            grid=grid,
            in_specs=in_specs,
            out_specs=out_spec,
            scratch_shapes=scratch),
        compiler_params=pltpu.CompilerParams(
            dimension_semantics=("parallel", "arbitrary")),
    )(*args)

    mean_log_prob_pos = out[:B, 0]
    return -jnp.mean(mean_log_prob_pos)


def _reference_supcon(features, labels=None, mask=None, temperature=0.07):
    # pure-JAX reference mirroring the PyTorch module, for sanity checking
    features = features.astype(jnp.float32).reshape(features.shape[0], -1)
    B = features.shape[0]
    if mask is None:
        if labels is None:
            mask = jnp.eye(B, dtype=jnp.float32)
        else:
            labels = jnp.asarray(labels).reshape(-1, 1)
            mask = (labels == labels.T).astype(jnp.float32)
    else:
        mask = jnp.asarray(mask, dtype=jnp.float32)
    sim = (features @ features.T) / temperature
    logits = sim - jnp.max(sim, axis=1, keepdims=True)
    logits_mask = jnp.ones((B, B), jnp.float32) - jnp.eye(B, dtype=jnp.float32)
    mask = mask * logits_mask
    exp_logits = jnp.exp(logits) * logits_mask
    log_prob = logits - jnp.log(exp_logits.sum(1, keepdims=True) + 1e-12)
    mask_labels = jnp.where(mask > 0, jnp.ones_like(mask), mask)
    mean_log_prob_pos = (mask * log_prob).sum(1) / (mask_labels.sum(1) + 1e-12)
    return -mean_log_prob_pos.mean()


if __name__ == "__main__":
    key = jax.random.PRNGKey(0)
    kf, kl, kf2, kl2 = jax.random.split(key, 4)

    # Shapes consistent with the module's forward: [bsz, ...] flattened to [bsz, D].
    B, D = 8, 32
    feats = jax.random.normal(kf, (B, D), dtype=jnp.float32)
    feats = feats / jnp.linalg.norm(feats, axis=1, keepdims=True)
    labels = jax.random.randint(kl, (B,), 0, 3)

    # 1) supervised (labels) path
    loss = jax.block_until_ready(supcon_loss(feats, labels=labels, temperature=0.07))
    ref = _reference_supcon(feats, labels=labels, temperature=0.07)
    assert jnp.allclose(loss, ref, atol=1e-4, rtol=1e-4), (loss, ref)

    # 2) explicit user-mask path (same positives -> same loss)
    mask = (labels[:, None] == labels[None, :]).astype(jnp.float32)
    loss_m = jax.block_until_ready(supcon_loss(feats, mask=mask, temperature=0.07))
    assert jnp.allclose(loss_m, ref, atol=1e-4, rtol=1e-4), (loss_m, ref)

    # 3) unsupervised / SimCLR default (mask = eye)
    loss_u = jax.block_until_ready(supcon_loss(feats, temperature=0.07))
    ref_u = _reference_supcon(feats, temperature=0.07)
    assert jnp.allclose(loss_u, ref_u, atol=1e-4, rtol=1e-4), (loss_u, ref_u)

    # 4) non-multiple-of-8 batch exercises the padding / masked-column path
    B2 = 10
    feats2 = jax.random.normal(kf2, (B2, D), dtype=jnp.float32)
    feats2 = feats2 / jnp.linalg.norm(feats2, axis=1, keepdims=True)
    labels2 = jax.random.randint(kl2, (B2,), 0, 4)
    loss2 = jax.block_until_ready(supcon_loss(feats2, labels=labels2, temperature=0.07))
    ref2 = _reference_supcon(feats2, labels=labels2, temperature=0.07)
    assert jnp.allclose(loss2, ref2, atol=1e-4, rtol=1e-4), (loss2, ref2)

    # 5) bf16 features run the MXU at native rate with f32 accumulation
    loss_bf16 = jax.block_until_ready(
        supcon_loss(feats.astype(jnp.bfloat16), labels=labels, temperature=0.07))
    assert bool(jnp.isfinite(loss_bf16)), loss_bf16

    print("KERNEL_OK")
</pallas_src>

<mosaic_0001>
module attributes {stable_mosaic.version = 11 : i64} {
  func.func @_supcon_kernel(%arg0: i32, %arg1: i32, %arg2: memref<8x1xi32, #tpu.memory_space<vmem>>, %arg3: memref<1x8xi32, #tpu.memory_space<vmem>>, %arg4: memref<8x32xf32, #tpu.memory_space<vmem>>, %arg5: memref<8x32xf32, #tpu.memory_space<vmem>>, %arg6: memref<8x128xf32, #tpu.memory_space<vmem>>, %arg7: memref<8x1xf32, #tpu.memory_space<vmem>>, %arg8: memref<8x1xf32, #tpu.memory_space<vmem>>, %arg9: memref<8x1xf32, #tpu.memory_space<vmem>>, %arg10: memref<8x1xf32, #tpu.memory_space<vmem>>, %arg11: memref<8x1xf32, #tpu.memory_space<vmem>>) attributes {dimension_semantics = [#tpu.dimension_semantics<parallel>, #tpu.dimension_semantics<arbitrary>], iteration_bounds = array<i64: 1, 1>, scalar_prefetch = 0 : i64, scratch_operands = 5 : i64, tpu.core_type = #tpu.core_type<tc>, window_params = [{transform_indices = @transform_0, window_bounds = array<i64: 8, 1>}, {transform_indices = @transform_1, window_bounds = array<i64: 1, 8>}, {transform_indices = @transform_2, window_bounds = array<i64: 8, 32>}, {transform_indices = @transform_3, window_bounds = array<i64: 8, 32>}, {transform_indices = @transform_4, window_bounds = array<i64: 8, 128>}]} {
    %c0_i32 = arith.constant 0 : i32
    %0 = arith.cmpi eq, %arg1, %c0_i32 : i32
    %1 = arith.extui %0 : i1 to i32
    %c0_i32_0 = arith.constant 0 : i32
    %2 = arith.cmpi ne, %1, %c0_i32_0 : i32
    scf.if %2 {
      %cst_40 = arith.constant -1.000000e+30 : f32
      %66 = vector.broadcast %cst_40 : f32 to vector<8x1xf32>
      %c0_41 = arith.constant 0 : index
      %c0_42 = arith.constant 0 : index
      %67 = vector.load %arg7[%c0_41, %c0_42] : memref<8x1xf32, #tpu.memory_space<vmem>>, vector<8x1xf32>
      tpu.vector_store %arg7[%c0_41, %c0_42], %66 {strides = array<i32>} : memref<8x1xf32, #tpu.memory_space<vmem>>, vector<8x1xf32>,
      %cst_43 = arith.constant 0.000000e+00 : f32
      %68 = vector.broadcast %cst_43 : f32 to vector<8x1xf32>
      %c0_44 = arith.constant 0 : index
      %c0_45 = arith.constant 0 : index
      %69 = vector.load %arg8[%c0_44, %c0_45] : memref<8x1xf32, #tpu.memory_space<vmem>>, vector<8x1xf32>
      tpu.vector_store %arg8[%c0_44, %c0_45], %68 {strides = array<i32>} : memref<8x1xf32, #tpu.memory_space<vmem>>, vector<8x1xf32>,
      %cst_46 = arith.constant 0.000000e+00 : f32
      %70 = vector.broadcast %cst_46 : f32 to vector<8x1xf32>
      %c0_47 = arith.constant 0 : index
      %c0_48 = arith.constant 0 : index
      %71 = vector.load %arg9[%c0_47, %c0_48] : memref<8x1xf32, #tpu.memory_space<vmem>>, vector<8x1xf32>
      tpu.vector_store %arg9[%c0_47, %c0_48], %70 {strides = array<i32>} : memref<8x1xf32, #tpu.memory_space<vmem>>, vector<8x1xf32>,
      %cst_49 = arith.constant 0.000000e+00 : f32
      %72 = vector.broadcast %cst_49 : f32 to vector<8x1xf32>
      %c0_50 = arith.constant 0 : index
      %c0_51 = arith.constant 0 : index
      %73 = vector.load %arg10[%c0_50, %c0_51] : memref<8x1xf32, #tpu.memory_space<vmem>>, vector<8x1xf32>
      tpu.vector_store %arg10[%c0_50, %c0_51], %72 {strides = array<i32>} : memref<8x1xf32, #tpu.memory_space<vmem>>, vector<8x1xf32>,
      %cst_52 = arith.constant 0.000000e+00 : f32
      %74 = vector.broadcast %cst_52 : f32 to vector<8x1xf32>
      %c0_53 = arith.constant 0 : index
      %c0_54 = arith.constant 0 : index
      %75 = vector.load %arg11[%c0_53, %c0_54] : memref<8x1xf32, #tpu.memory_space<vmem>>, vector<8x1xf32>
      tpu.vector_store %arg11[%c0_53, %c0_54], %74 {strides = array<i32>} : memref<8x1xf32, #tpu.memory_space<vmem>>, vector<8x1xf32>,
    } else {
    }
    %c0 = arith.constant 0 : index
    %c0_1 = arith.constant 0 : index
    %3 = vector.load %arg4[%c0, %c0_1] : memref<8x32xf32, #tpu.memory_space<vmem>>, vector<8x32xf32>
    %c0_2 = arith.constant 0 : index
    %c0_3 = arith.constant 0 : index
    %4 = vector.load %arg5[%c0_2, %c0_3] : memref<8x32xf32, #tpu.memory_space<vmem>>, vector<8x32xf32>
    %cst = arith.constant dense<0.000000e+00> : vector<8x8xf32>
    %5 = tpu.matmul %3, %4, %cst {dimension_numbers = #tpu.dot_dimension_numbers<[1], [1], [0], [0], [0, 0, 1, 0], [], []>} : vector<8x32xf32>, vector<8x32xf32>, vector<8x8xf32> -> vector<8x8xf32>
    %cst_4 = arith.constant 14.2857141 : f32
    %6 = vector.broadcast %cst_4 : f32 to vector<8x8xf32>
    %7 = arith.mulf %5, %6 : vector<8x8xf32>
    %c8_i32 = arith.constant 8 : i32
    %8 = arith.muli %arg0, %c8_i32 : i32
    %9 = tpu.iota {dimensions = array<i32: 0>} : vector<8x8xi32>
    %10 = vector.broadcast %8 : i32 to vector<8x8xi32>
    %11 = arith.addi %10, %9 : vector<8x8xi32>
    %c8_i32_5 = arith.constant 8 : i32
    %12 = arith.muli %arg1, %c8_i32_5 : i32
    %13 = tpu.iota {dimensions = array<i32: 1>} : vector<8x8xi32>
    %14 = vector.broadcast %12 : i32 to vector<8x8xi32>
    %15 = arith.addi %14, %13 : vector<8x8xi32>
    %c8_i32_6 = arith.constant 8 : i32
    %16 = vector.broadcast %c8_i32_6 : i32 to vector<8x8xi32>
    %17 = arith.cmpi slt, %15, %16 : vector<8x8xi32>
    %18 = arith.cmpi ne, %11, %15 : vector<8x8xi32>
    %19 = arith.andi %17, %18 : vector<8x8xi1>
    %c0_7 = arith.constant 0 : index
    %c0_8 = arith.constant 0 : index
    %20 = vector.load %arg7[%c0_7, %c0_8] : memref<8x1xf32, #tpu.memory_space<vmem>>, vector<8x1xf32>
    %cst_9 = arith.constant -1.000000e+30 : f32
    %21 = vector.broadcast %cst_9 : f32 to vector<8x8xf32>
    %22 = arith.select %17, %7, %21 : vector<8x8xi1>, vector<8x8xf32>
    %cst_10 = arith.constant dense<0xFF800000> : vector<8xf32>
    %23 = vector.multi_reduction <maximumf>, %22, %cst_10 [1] : vector<8x8xf32> to vector<8xf32>
    %24 = vector.shape_cast %23 : vector<8xf32> to vector<8x1xf32>
    %25 = arith.maximumf %20, %24 : vector<8x1xf32>
    %26 = arith.subf %20, %25 : vector<8x1xf32>
    %27 = math.exp %26 : vector<8x1xf32>
    %cst_11 = arith.constant -1.000000e+30 : f32
    %28 = vector.broadcast %cst_11 : f32 to vector<8x8xf32>
    %29 = arith.select %19, %7, %28 : vector<8x8xi1>, vector<8x8xf32>
    %30 = vector.broadcast %25 : vector<8x1xf32> to vector<8x8xf32>
    %31 = arith.subf %29, %30 : vector<8x8xf32>
    %32 = math.exp %31 : vector<8x8xf32>
    %c0_12 = arith.constant 0 : index
    %c0_13 = arith.constant 0 : index
    %33 = vector.load %arg8[%c0_12, %c0_13] : memref<8x1xf32, #tpu.memory_space<vmem>>, vector<8x1xf32>
    %34 = arith.mulf %27, %33 : vector<8x1xf32>
    %cst_14 = arith.constant dense<0.000000e+00> : vector<8xf32>
    %35 = vector.multi_reduction <add>, %32, %cst_14 [1] : vector<8x8xf32> to vector<8xf32>
    %36 = vector.shape_cast %35 : vector<8xf32> to vector<8x1xf32>
    %37 = arith.addf %34, %36 : vector<8x1xf32>
    %c0_15 = arith.constant 0 : index
    %c0_16 = arith.constant 0 : index
    %38 = vector.load %arg8[%c0_15, %c0_16] : memref<8x1xf32, #tpu.memory_space<vmem>>, vector<8x1xf32>
    tpu.vector_store %arg8[%c0_15, %c0_16], %37 {strides = array<i32>} : memref<8x1xf32, #tpu.memory_space<vmem>>, vector<8x1xf32>,
    %c0_17 = arith.constant 0 : index
    %c0_18 = arith.constant 0 : index
    %39 = vector.load %arg7[%c0_17, %c0_18] : memref<8x1xf32, #tpu.memory_space<vmem>>, vector<8x1xf32>
    tpu.vector_store %arg7[%c0_17, %c0_18], %25 {strides = array<i32>} : memref<8x1xf32, #tpu.memory_space<vmem>>, vector<8x1xf32>,
    %c0_19 = arith.constant 0 : index
    %c0_20 = arith.constant 0 : index
    %40 = vector.load %arg2[%c0_19, %c0_20] : memref<8x1xi32, #tpu.memory_space<vmem>>, vector<8x1xi32>
    %c0_21 = arith.constant 0 : index
    %c0_22 = arith.constant 0 : index
    %41 = vector.load %arg3[%c0_21, %c0_22] : memref<1x8xi32, #tpu.memory_space<vmem>>, vector<1x8xi32>
    %42 = vector.broadcast %40 : vector<8x1xi32> to vector<8x8xi32>
    %43 = vector.broadcast %41 : vector<1x8xi32> to vector<8x8xi32>
    %44 = arith.cmpi eq, %42, %43 : vector<8x8xi32>
    %45 = arith.andi %19, %44 : vector<8x8xi1>
    %46 = arith.extui %45 : vector<8x8xi1> to vector<8x8xi32>
    %47 = arith.sitofp %46 : vector<8x8xi32> to vector<8x8xf32>
    %cst_23 = arith.constant dense<0.000000e+00> : vector<8xf32>
    %48 = vector.multi_reduction <add>, %47, %cst_23 [1] : vector<8x8xf32> to vector<8xf32>
    %49 = vector.shape_cast %48 : vector<8xf32> to vector<8x1xf32>
    %c0_24 = arith.constant 0 : index
    %c0_25 = arith.constant 0 : index
    %50 = vector.load %arg9[%c0_24, %c0_25] : memref<8x1xf32, #tpu.memory_space<vmem>>, vector<8x1xf32>
    %cst_26 = arith.constant 0.000000e+00 : f32
    %51 = vector.broadcast %cst_26 : f32 to vector<8x8xf32>
    %52 = arith.select %45, %7, %51 : vector<8x8xi1>, vector<8x8xf32>
    %cst_27 = arith.constant dense<0.000000e+00> : vector<8xf32>
    %53 = vector.multi_reduction <add>, %52, %cst_27 [1] : vector<8x8xf32> to vector<8xf32>
    %54 = vector.shape_cast %53 : vector<8xf32> to vector<8x1xf32>
    %55 = arith.addf %50, %54 : vector<8x1xf32>
    %c0_28 = arith.constant 0 : index
    %c0_29 = arith.constant 0 : index
    %56 = vector.load %arg9[%c0_28, %c0_29] : memref<8x1xf32, #tpu.memory_space<vmem>>, vector<8x1xf32>
    tpu.vector_store %arg9[%c0_28, %c0_29], %55 {strides = array<i32>} : memref<8x1xf32, #tpu.memory_space<vmem>>, vector<8x1xf32>,
    %c0_30 = arith.constant 0 : index
    %c0_31 = arith.constant 0 : index
    %57 = vector.load %arg10[%c0_30, %c0_31] : memref<8x1xf32, #tpu.memory_space<vmem>>, vector<8x1xf32>
    %58 = arith.addf %57, %49 : vector<8x1xf32>
    %c0_32 = arith.constant 0 : index
    %c0_33 = arith.constant 0 : index
    %59 = vector.load %arg10[%c0_32, %c0_33] : memref<8x1xf32, #tpu.memory_space<vmem>>, vector<8x1xf32>
    tpu.vector_store %arg10[%c0_32, %c0_33], %58 {strides = array<i32>} : memref<8x1xf32, #tpu.memory_space<vmem>>, vector<8x1xf32>,
    %c0_34 = arith.constant 0 : index
    %c0_35 = arith.constant 0 : index
    %60 = vector.load %arg11[%c0_34, %c0_35] : memref<8x1xf32, #tpu.memory_space<vmem>>, vector<8x1xf32>
    %61 = arith.addf %60, %49 : vector<8x1xf32>
    %c0_36 = arith.constant 0 : index
    %c0_37 = arith.constant 0 : index
    %62 = vector.load %arg11[%c0_36, %c0_37] : memref<8x1xf32, #tpu.memory_space<vmem>>, vector<8x1xf32>
    tpu.vector_store %arg11[%c0_36, %c0_37], %61 {strides = array<i32>} : memref<8x1xf32, #tpu.memory_space<vmem>>, vector<8x1xf32>,
    %c0_i32_38 = arith.constant 0 : i32
    %63 = arith.cmpi eq, %arg1, %c0_i32_38 : i32
    %64 = arith.extui %63 : i1 to i32
    %c0_i32_39 = arith.constant 0 : i32
    %65 = arith.cmpi ne, %64, %c0_i32_39 : i32
    scf.if %65 {
      %c0_40 = arith.constant 0 : index
      %c0_41 = arith.constant 0 : index
      %66 = vector.load %arg8[%c0_40, %c0_41] : memref<8x1xf32, #tpu.memory_space<vmem>>, vector<8x1xf32>
      %cst_42 = arith.constant 9.99999996E-13 : f32
      %67 = vector.broadcast %cst_42 : f32 to vector<8x1xf32>
      %68 = arith.addf %66, %67 : vector<8x1xf32>
      %69 = math.log %68 : vector<8x1xf32>
      %c0_43 = arith.constant 0 : index
      %c0_44 = arith.constant 0 : index
      %70 = vector.load %arg9[%c0_43, %c0_44] : memref<8x1xf32, #tpu.memory_space<vmem>>, vector<8x1xf32>
      %c0_45 = arith.constant 0 : index
      %c0_46 = arith.constant 0 : index
      %71 = vector.load %arg10[%c0_45, %c0_46] : memref<8x1xf32, #tpu.memory_space<vmem>>, vector<8x1xf32>
      %c0_47 = arith.constant 0 : index
      %c0_48 = arith.constant 0 : index
      %72 = vector.load %arg7[%c0_47, %c0_48] : memref<8x1xf32, #tpu.memory_space<vmem>>, vector<8x1xf32>
      %73 = arith.addf %72, %69 : vector<8x1xf32>
      %74 = arith.mulf %71, %73 : vector<8x1xf32>
      %75 = arith.subf %70, %74 : vector<8x1xf32>
      %c0_49 = arith.constant 0 : index
      %c0_50 = arith.constant 0 : index
      %76 = vector.load %arg11[%c0_49, %c0_50] : memref<8x1xf32, #tpu.memory_space<vmem>>, vector<8x1xf32>
      %cst_51 = arith.constant 9.99999996E-13 : f32
      %77 = vector.broadcast %cst_51 : f32 to vector<8x1xf32>
      %78 = arith.addf %76, %77 : vector<8x1xf32>
      %79 = arith.divf %75, %78 : vector<8x1xf32>
      %80 = vector.shape_cast %79 : vector<8x1xf32> to vector<8x1xf32>
      %81 = vector.broadcast %80 : vector<8x1xf32> to vector<8x128xf32>
      %c0_52 = arith.constant 0 : index
      %c0_53 = arith.constant 0 : index
      %82 = vector.load %arg6[%c0_52, %c0_53] : memref<8x128xf32, #tpu.memory_space<vmem>>, vector<8x128xf32>
      tpu.vector_store %arg6[%c0_52, %c0_53], %81 {strides = array<i32>} : memref<8x128xf32, #tpu.memory_space<vmem>>, vector<8x128xf32>,
    } else {
    }
    return
  }
  func.func @transform_0(%arg0: i32, %arg1: i32) -> (i32, i32) {
    %c0_i32 = arith.constant 0 : i32
    %c0_i32_0 = arith.constant 0 : i32
    return %arg0, %c0_i32 : i32, i32
  }
  func.func @transform_1(%arg0: i32, %arg1: i32) -> (i32, i32) {
    %c0_i32 = arith.constant 0 : i32
    %c0_i32_0 = arith.constant 0 : i32
    return %c0_i32, %arg1 : i32, i32
  }
  func.func @transform_2(%arg0: i32, %arg1: i32) -> (i32, i32) {
    %c0_i32 = arith.constant 0 : i32
    %c0_i32_0 = arith.constant 0 : i32
    return %arg0, %c0_i32 : i32, i32
  }
  func.func @transform_3(%arg0: i32, %arg1: i32) -> (i32, i32) {
    %c0_i32 = arith.constant 0 : i32
    %c0_i32_0 = arith.constant 0 : i32
    return %arg1, %c0_i32 : i32, i32
  }
  func.func @transform_4(%arg0: i32, %arg1: i32) -> (i32, i32) {
    %c0_i32 = arith.constant 0 : i32
    %c0_i32_0 = arith.constant 0 : i32
    return %arg0, %c0_i32 : i32, i32
  }
}

</mosaic_0001>

<bundles_post_ra>
// kernel: tpu_custom_call.1
= control target key start
LH: loop header
LB: loop body
LE: loop exit
PB: predicated region body
PF: predicated region fallthrough
CT: control target
= control target key end

     0   :  { %9 = vsyncpa [#allocation8], 0  ;;  %s339_s0 = inlined_call_operand.vmem [shape: s32[8,1], index: 0, kind: input, shape index: {}]   ;;  %s340_s1 = inlined_call_operand.vmem [shape: s32[1,8], index: 1, kind: input, shape index: {}]   ;;  %s341_s2 = inlined_call_operand.vmem [shape: f32[8,32], index: 2, kind: input, shape index: {}]   ;;  %s342_s3 = inlined_call_operand.hbm [shape: f32[8,32], index: 3, kind: input, shape index: {}]   ;;  %s343_s4 = inlined_call_operand.hbm [shape: f32[8,128], index: 4, kind: output, shape index: {}]  }
   0x1   :  { %10 = vsyncpa [#allocation9], 0  ;;  %s22_s17 = sshll.u32 %s342_s3, 4  ;;  %s264_s18 = smov [#allocation7]   ;;  %s23_s17 = int_to_ptr.hbm [resolvable:$true] %s22_s17 }
   0x2   :  { %s24_s19 = sshll.u32 %s264_s18, 4  ;;  %s25_s19 = int_to_ptr.vmem [resolvable:$true] %s24_s19 }
   0x3   :  { %27 = dma.hbm_to_vmem [thread:$0]  %s23_s17, 128, %s25_s19, [#allocation8]  }
   0x4   :  { %260 = dma.done.wait [#allocation8], 128  }
   0x5   :  { %261 = vsyncadd [#allocation8], 4294967168  ;;  %v73_v0 = vlaneseq  ;;  %v265_v1 = vmov 0   ;;  %vm44_vm1 = vcmask 261120   ;;  %v43_v4 = vld [vmem:[#allocation7] sm:$0xff]  ;;  %v113_v5 = vld [vmem:[%s339_s0] sm:$0xff] }
   0x6   :  { %201 = vset.pattern.permute.xlu1 %v265_v1  ;;  %200 = vset.pattern.permute.xlu0 %v265_v1  ;;  %v42_v6 = vld [vmem:[%s341_s2] sm:$0xff]  ;;  %vm36_vm2 = vcmask 7168   ;;  %v266_v7 = vmov -1e+30   ;;  %vm87_vm5 = vcmask 64512   ;;  %v267_v17 = vmov 0.0  }
   0x7   :  { %v74_v2 = vshrl.u32 %v73_v0, 7  ;;  %v79_v3 = vand.u32 127, %v73_v0  ;;  %202 = vset.pattern.permute.xlu2 %v265_v1  ;;  %192 = vmatpush.xpose.msk.msra.mxu0 %vm44_vm1, %v43_v4  ;;  %37 = vst.msk [vmem:[#allocation2] sm:$0xff] %vm36_vm2, %v266_v7  ;;  %v203_v14 = vld [vmem:[%s340_s1] ss:$0 sm:$0xff]  ;;  %s268_s1 = smov [#allocation10]  }
   0x8   :  { %116 = vperm.xlu1 %201, %v113_v5   ;;  %38 = vst.msk [vmem:[#allocation3] sm:$0xff] %vm36_vm2, %v267_v17  ;;  %s180_s23 = sshll.u32 %s268_s1, 4  ;;  %s182_s26 = sshll.u32 %s343_s4, 4  ;;  %s181_s23 = int_to_ptr.vmem [resolvable:$true] %s180_s23  ;;  %s183_s26 = int_to_ptr.hbm [resolvable:$true] %s182_s26 }
   0x9   :  { %vm83_vm0 = vcmp.ne.s32.totalorder %v74_v2, %v79_v3  ;;  %vm82_vm3 = vcmp.lt.s32.totalorder %v79_v3, 8  ;;  %39 = vst.msk [vmem:[#allocation4] sm:$0xff] %vm36_vm2, %v267_v17 }
   0xa   :  { %193 = vmatmul.msk.f32.vlgmr.msra.gmra.mxu0 %vm44_vm1, %v42_v6  ;;  %vm304_vm4 = vmand %vm82_vm3, %vm83_vm0  ;;  %40 = vst.msk [vmem:[#allocation5] sm:$0xff] %vm36_vm2, %v267_v17 }
   0xb   :  { %41 = vst.msk [vmem:[#allocation6] sm:$0xff] %vm36_vm2, %v267_v17 }
   0xe   :  { %v85_v20 = vld [vmem:[#allocation2] sm:$0xff] }
   0xf   :  { %v104_v40 = vld [vmem:[#allocation3] sm:$0xff] }
  0x10   :  { %v126_v45 = vld [vmem:[#allocation4] sm:$0xff] }
  0x11   :  { %v133_v25 = vld [vmem:[#allocation5] sm:$0xff] }
  0x12   :  { %v136_v26 = vld [vmem:[#allocation6] sm:$0xff] }
  0x7a   :  { %v117_v15 = vpop.permute.xlu1 %116 }
  0x7b   :  { %vm119_vm6 = vcmp.eq.s32.totalorder %v117_v15, %v203_v14 }
  0x7c   :  { %vm316_vm7 = vmand %vm304_vm4, %vm119_vm6 }
  0x7d   :  { %v194_v18 = vsel %vm316_vm7, 1.0, %v267_v17 }
  0x7e   :  { %v123_v19 = vsel %vm87_vm5, %v194_v18, 0.0 }
  0x7f   :  { %124 = vadd.xlane.f32.xlu1 %v123_v19 }
  0x87   :  { %v68_v9 = vpop.f32.mrf.mxu0 }
  0x88   :  { %v71_v10 = vmul.f32 14.285714, %v68_v9 }
  0x8a   :  { %v86_v11 = vsel %vm82_vm3, %v71_v10, -1e+30  ;;  %v95_v12 = vsel %vm304_vm4, %v71_v10, -1e+30  ;;  %v127_v34 = vsel %vm316_vm7, %v71_v10, 0.0 }
  0x8b   :  { %v88_v13 = vsel %vm87_vm5, %v86_v11, -inf  ;;  %v128_v35 = vsel %vm87_vm5, %v127_v34, 0.0 }
  0x8c   :  { %89 = vmax.xlane.f32.xlu0 %v88_v13 }
  0xf2   :  { %v125_v24 = vpop.xlane.xlu1 %124 }
  0xf3   :  { %v134_v27 = vadd.f32 %v133_v25, %v125_v24  ;;  %v137_v28 = vadd.f32 %v136_v26, %v125_v24 }
  0xf5   :  { %135 = vst.msk [vmem:[#allocation5] sm:$0xff] %vm36_vm2, %v134_v27 }
  0xf6   :  { %138 = vst.msk [vmem:[#allocation6] sm:$0xff] %vm36_vm2, %v137_v28 }
  0xfc   :  { %v147_v60 = vld [vmem:[#allocation5] sm:$0xff] }
  0xfd   :  { %v152_v37 = vld [vmem:[#allocation6] sm:$0xff] }
  0xfe   :  { %v153_v38 = vadd.f32 1e-12, %v152_v37 }
  0xff   :  { %v90_v21 = vpop.xlane.xlu0 %89 }
 0x100   :  { %v91_v22 = vmax.f32 %v85_v20, %v90_v21  ;;  %vm159_vm8 = vweird.f32 %v153_v38  ;;  %v165_v54 = vand.u32 2147483648, %v153_v38  ;;  %v163_v57 = vand.u32 2147483647, %v153_v38 }
 0x102   :  { %v92_v23 = vsub.f32 %v85_v20, %v91_v22  ;;  %112 = vst.msk [vmem:[#allocation2] sm:$0xff] %vm36_vm2, %v91_v22  ;;  %98 = vperm.xlu0 %200, %v91_v22   ;;  %v166_v61 = vor.u32 1.1754944e-38, %v165_v54  ;;  %vm164_vm11 = vcmp.eq.f32.partialorder %v163_v57, 8.507059e+37 }
 0x104   :  { %v93_v36 = vmul.f32 1.442695, %v92_v23 }
 0x109   :  { %v148_v58 = vld [vmem:[#allocation2] sm:$0xff] }
 0x174   :  { %v99_v29 = vpop.permute.xlu0 %98 }
 0x175   :  { %v101_v30 = vsub.f32 %v95_v12, %v99_v29 }
 0x177   :  { %v102_v31 = vmul.f32 1.442695, %v101_v30 }
 0x179   :  { %204 = vpow2.f32 %v102_v31 }
 0x17a   :  { %206 = vpow2.f32 %v93_v36 }
 0x17b   :  { %208 = vrcp.f32 %v153_v38 }
 0x17f   :  { %v205_v32 = vpop.eup %204 }
 0x180   :  { %v106_v33 = vsel %vm87_vm5, %v205_v32, 0.0  ;;  %v207_v39 = vpop.eup %206 }
 0x181   :  { %107 = vadd.xlane.f32.xlu2 %v106_v33  ;;  %v105_v41 = vmul.f32 %v207_v39, %v104_v40  ;;  %v209_v44 = vpop.eup %208 }
 0x182   :  { %v155_v47 = vmul.f32 %v209_v44, %v153_v38  ;;  %vm160_vm9 = vweird.f32 %v209_v44 }
 0x183   :  { %vm161_vm10 = vmor %vm159_vm8, %vm160_vm9 }
 0x184   :  { %v156_v51 = vsub.f32 1.0, %v155_v47 }
 0x186   :  { %v157_v52 = vmul.f32 %v209_v44, %v156_v51 }
 0x188   :  { %v158_v56 = vadd.f32 %v209_v44, %v157_v52 }
 0x189   :  { %129 = vadd.xlane.f32.xlu2 %v128_v35 }
 0x18a   :  { %v162_v63 = vsel %vm161_vm10, %v209_v44, %v158_v56 }
 0x18b   :  { %v167_v2 = vsel %vm164_vm11, %v166_v61, %v162_v63 }
 0x1f4   :  { %v108_v42 = vpop.xlane.xlu2 %107 }
 0x1f5   :  { %v109_v43 = vadd.f32 %v108_v42, %v105_v41 }
 0x1f7   :  { %111 = vst.msk [vmem:[#allocation3] sm:$0xff] %vm36_vm2, %v109_v43 }
 0x1fc   :  { %v130_v46 = vpop.xlane.xlu2 %129 }
 0x1fd   :  { %v131_v48 = vadd.f32 %v130_v46, %v126_v45 }
 0x1fe   :  { %v142_v49 = vld [vmem:[#allocation3] sm:$0xff] }
 0x1ff   :  { %132 = vst.msk [vmem:[#allocation4] sm:$0xff] %vm36_vm2, %v131_v48  ;;  %v143_v50 = vadd.f32 1e-12, %v142_v49 }
 0x201   :  { %210 = vlog2.f32 %v143_v50 }
 0x206   :  { %v146_v0 = vld [vmem:[#allocation4] sm:$0xff] }
 0x207   :  { %v211_v53 = vpop.eup %210 }
 0x208   :  { %v145_v55 = vmul.f32 0.6931472, %v211_v53 }
 0x20a   :  { %v149_v59 = vadd.f32 %v148_v58, %v145_v55 }
 0x20c   :  { %v150_v62 = vmul.f32 %v149_v59, %v147_v60 }
 0x20e   :  { %v151_v1 = vsub.f32 %v146_v0, %v150_v62 }
 0x210   :  { %v168_v3 = vmul.f32 %v167_v2, %v151_v1 }
 0x212   :  { %171 = vperm.xlu2 %202, %v168_v3  }
 0x26c   :  { %v172_v4 = vpop.permute.xlu2 %171 }
 0x26d   :  { %174 = vst [vmem:[#allocation10] sm:$0xff] %v172_v4 }
 0x26e   :  { %185 = dma.vmem_to_hbm [thread:$0]  %s181_s23, 128, %s183_s26, [#allocation9]  }
 0x26f   :  { %262 = dma.done.wait [#allocation9], 128  }
 0x270   :  { %263 = vsyncadd [#allocation9], 4294967168 }
 0x271   :  { %190 = vsyncpa [#allocation8], 1 }
 0x272   :  { %191 = vsyncpa [#allocation9], 1 }

</bundles_post_ra>
